<compile_context>
chip_gen: v7x
topology: tpu7x:2x2x1
jax: 0.10.0
libtpu: 0.0.40
codegen_flags: <defaults>
</compile_context>

<pallas_src>
import math
import functools

import jax
import jax.numpy as jnp
from jax import lax
from jax.experimental import pallas as pl
from jax.experimental.pallas import tpu as pltpu

_INV_SQRT2 = 1.0 / math.sqrt(2.0)


def _round_up(n, m):
    return ((n + m - 1) // m) * m


def _vmem_capacity_bytes():
    """Physical VMEM per core; conservative 64 MiB fallback (v7x per-TC)."""
    try:
        return int(pltpu.get_tpu_info().vmem_capacity_bytes)
    except Exception:
        return 64 * 1024 * 1024


def _ffn_kernel(x_ref, w1_ref, b1_ref, w2_ref, b2_ref, o_ref, acc_ref, *,
                approx_gelu, mxu_dtype):
    """Grid (i, k): i = row tile, k = hidden-dim tile (reduction of linear_2)."""
    k = pl.program_id(1)

    @pl.when(k == 0)
    def _init():
        acc_ref[...] = jnp.zeros_like(acc_ref)

    x = x_ref[...]
    w1 = w1_ref[...]
    if mxu_dtype is not None:
        x = x.astype(mxu_dtype)
        w1 = w1.astype(mxu_dtype)

    # linear_1 (this hidden tile), f32 accumulation on the MXU.
    h = jnp.dot(x, w1, preferred_element_type=jnp.float32)
    h = h + b1_ref[...].astype(jnp.float32)

    # dropout_1: identity (p=0 / eval)

    if approx_gelu:
        h = jax.nn.gelu(h, approximate=True)              # tanh path -> EUP
    else:
        h = 0.5 * h * (1.0 + lax.erf(h * _INV_SQRT2))     # exact torch GELU

    w2 = w2_ref[...]
    h_dtype = mxu_dtype if mxu_dtype is not None else w2.dtype
    if mxu_dtype is not None:
        w2 = w2.astype(mxu_dtype)

    # linear_2 partial product for this hidden tile, accumulated in f32.
    acc_ref[...] += jnp.dot(h.astype(h_dtype), w2,
                            preferred_element_type=jnp.float32)

    # dropout_2: identity (p=0 / eval)

    @pl.when(k == pl.num_programs(1) - 1)
    def _finalize():
        o_ref[...] = (acc_ref[...]
                      + b2_ref[...].astype(jnp.float32)).astype(o_ref.dtype)


def prepare_params(w1, b1, w2, b2):
    """One-time parameter prep: pad F_in and D up to multiples of 128.

    Zero padding is exact: zero x columns / W1 rows contribute nothing,
    gelu(0)=0 feeds zero W2 rows, and padded output columns are sliced off.
    Call once at init (not per forward) so the pad never re-materializes in HBM.
    """
    f_in, d = w1.shape
    f_in_pad = _round_up(f_in, 128)
    d_pad = _round_up(d, 128)
    if f_in_pad != f_in:
        w1 = jnp.pad(w1, ((0, f_in_pad - f_in), (0, 0)))
    if d_pad != d:
        w1 = jnp.pad(w1, ((0, 0), (0, d_pad - d)))
        b1 = jnp.pad(b1, (0, d_pad - d))
        w2 = jnp.pad(w2, ((0, d_pad - d), (0, d_pad - d)))
        b2 = jnp.pad(b2, (0, d_pad - d))
    return w1, b1.reshape(1, d_pad), w2, b2.reshape(1, d_pad)


def feed_forward_pallas(x, w1, b1, w2, b2, *, out_dim, tile_rows=None,
                        cast_to_bf16=False, approx_gelu=False):
    """x: [..., F_in] (unpadded). w1/b1/w2/b2: from prepare_params (128-padded).
    out_dim: original (unpadded) output width D."""
    f_in_pad, d_pad = w1.shape
    assert w2.shape == (d_pad, d_pad), "weights must come from prepare_params"

    orig_shape = x.shape
    f_in = orig_shape[-1]
    x2d = x.reshape(-1, f_in)
    n_tokens = x2d.shape[0]
    if f_in_pad != f_in:                       # lane-dense x tiles
        x2d = jnp.pad(x2d, ((0, 0), (0, f_in_pad - f_in)))

    x_bytes = jnp.dtype(x.dtype).itemsize
    w_bytes = jnp.dtype(w1.dtype).itemsize
    out_bytes = x_bytes
    vmem_cap = _vmem_capacity_bytes()

    # Row tile: sublane-aligned for the input dtype packing (f32->8, bf16->16,
    # int8/fp8->32); 512 rows on 128 MiB-class chips, 256 on v7x (64 MiB).
    if tile_rows is None:
        tile_rows = 512 if vmem_cap >= 96 * 1024 * 1024 else 256
    sublane = 8 * max(1, 4 // x_bytes)
    tm = min(tile_rows, _round_up(n_tokens, sublane))
    t_pad = _round_up(n_tokens, tm)
    if t_pad != n_tokens:
        x2d = jnp.pad(x2d, ((0, t_pad - n_tokens), (0, 0)))

    # Per-step VMEM footprint (includes f32 h/acc intermediates + cast copy).
    def footprint(tk, w_bufs):
        return (2 * tm * f_in_pad * x_bytes                    # x tile (x2 buf)
                + 2 * tm * d_pad * out_bytes                   # out tile (x2 buf)
                + w_bufs * (f_in_pad * tk + tk * d_pad + tk) * w_bytes  # w1/b1/w2
                + d_pad * w_bytes                              # b2 (single buf)
                + 2 * tm * d_pad * 4                           # f32 acc + final add
                + 3 * tm * tk * 4)                             # f32 h + cast copy

    # Hidden-dim tile: full (single-buffered) weight residency when it fits,
    # otherwise stream (f_in_pad, tk) / (tk, d_pad) weight tiles over a k axis.
    budget = int(0.75 * vmem_cap)
    if footprint(d_pad, 1) <= budget:
        tk = d_pad
    else:
        tk = 128
        for cand in (1024, 512, 256, 128):
            if d_pad % cand == 0 and footprint(cand, 2) <= budget:
                tk = cand
                break
    num_k = d_pad // tk
    weights_resident = (num_k == 1)
    w_bufs = 1 if weights_resident else 2

    grid = (t_pad // tm, num_k)

    def wspec(shape, index_map):
        if weights_resident:   # constant index map -> second buffer is waste
            return pl.BlockSpec(shape, index_map, pipeline_mode=pl.Buffered(1))
        return pl.BlockSpec(shape, index_map)

    in_specs = [
        pl.BlockSpec((tm, f_in_pad), lambda i, k: (i, 0)),   # x row tile
        wspec((f_in_pad, tk), lambda i, k: (0, k)),          # w1 hidden tile
        wspec((1, tk), lambda i, k: (0, k)),                 # b1 hidden tile
        wspec((tk, d_pad), lambda i, k: (k, 0)),             # w2 hidden tile
        pl.BlockSpec((1, d_pad), lambda i, k: (0, 0),
                     pipeline_mode=pl.Buffered(1)),          # b2 (always const)
    ]
    out_specs = pl.BlockSpec((tm, d_pad), lambda i, k: (i, 0))

    flops = 2 * t_pad * f_in_pad * d_pad + 2 * t_pad * d_pad * d_pad
    weight_bytes = (f_in_pad * d_pad + d_pad * d_pad + 2 * d_pad) * w_bytes
    weight_passes = 1 if weights_resident else (t_pad // tm)
    bytes_accessed = (t_pad * f_in_pad * x_bytes
                      + t_pad * d_pad * out_bytes
                      + weight_passes * weight_bytes)

    vmem_limit = int(min(max(int(1.4 * footprint(tk, w_bufs)), 32 * 1024 * 1024),
                         int(0.92 * vmem_cap)))

    kernel = functools.partial(
        _ffn_kernel,
        approx_gelu=approx_gelu,
        mxu_dtype=jnp.bfloat16 if cast_to_bf16 else None,
    )

    out2d = pl.pallas_call(
        kernel,
        out_shape=jax.ShapeDtypeStruct((t_pad, d_pad), x.dtype),
        grid_spec=pltpu.PrefetchScalarGridSpec(
            num_scalar_prefetch=0,
            grid=grid,
            in_specs=in_specs,
            out_specs=out_specs,
            scratch_shapes=[pltpu.VMEM((tm, d_pad), jnp.float32)],
        ),
        compiler_params=pltpu.CompilerParams(
            dimension_semantics=("parallel", "arbitrary"),
            vmem_limit_bytes=vmem_limit,
        ),
        cost_estimate=pl.CostEstimate(
            flops=flops,
            transcendentals=t_pad * d_pad,
            bytes_accessed=bytes_accessed,
        ),
    )(x2d, w1, b1, w2, b2)

    out2d = out2d[:n_tokens, :out_dim]
    return out2d.reshape(*orig_shape[:-1], out_dim)


def init_params(key, dim, num_inputs=1, dtype=jnp.float32):
    """Deterministic init mirroring nn.Linear's uniform(-1/sqrt(fan_in), ...)."""
    k1, k2, k3, k4 = jax.random.split(key, 4)
    fan1 = dim * num_inputs
    lim1 = 1.0 / math.sqrt(fan1)
    lim2 = 1.0 / math.sqrt(dim)
    # stored already transposed: [in, out]
    w1 = jax.random.uniform(k1, (fan1, dim), dtype, -lim1, lim1)
    b1 = jax.random.uniform(k2, (dim,), dtype, -lim1, lim1)
    w2 = jax.random.uniform(k3, (dim, dim), dtype, -lim2, lim2)
    b2 = jax.random.uniform(k4, (dim,), dtype, -lim2, lim2)
    return w1, b1, w2, b2


def reference_ffn(x, w1, b1, w2, b2):
    h = x @ w1 + b1
    h = 0.5 * h * (1.0 + lax.erf(h / math.sqrt(2.0)))
    return h @ w2 + b2


if __name__ == "__main__":
    dim = 32
    num_inputs = 1
    batch, seq = 2, 8  # 16 tokens total

    key = jax.random.PRNGKey(0)
    kx, kp = jax.random.split(key)
    x = jax.random.normal(kx, (batch, seq, dim * num_inputs), jnp.float32)
    w1, b1, w2, b2 = init_params(kp, dim, num_inputs)
    ref = reference_ffn(x, w1, b1, w2, b2)

    # One-time parameter prep (padding hoisted out of the forward pass).
    w1p, b1p, w2p, b2p = prepare_params(w1, b1, w2, b2)

    fn = jax.jit(functools.partial(feed_forward_pallas, out_dim=dim))
    out = jax.block_until_ready(fn(x, w1p, b1p, w2p, b2p))

    assert out.shape == (batch, seq, dim)
    assert jnp.allclose(out, ref, atol=1e-5, rtol=1e-5), "mismatch vs reference"

    print("KERNEL_OK")
</pallas_src>

<mosaic_0001>
module attributes {stable_mosaic.version = 11 : i64} {
  func.func @_ffn_kernel(%arg0: i32, %arg1: i32, %arg2: memref<16x128xf32, #tpu.memory_space<vmem>>, %arg3: memref<128x128xf32, #tpu.memory_space<vmem>>, %arg4: memref<1x128xf32, #tpu.memory_space<vmem>>, %arg5: memref<128x128xf32, #tpu.memory_space<vmem>>, %arg6: memref<1x128xf32, #tpu.memory_space<vmem>>, %arg7: memref<16x128xf32, #tpu.memory_space<vmem>>, %arg8: memref<16x128xf32, #tpu.memory_space<vmem>>) attributes {dimension_semantics = [#tpu.dimension_semantics<parallel>, #tpu.dimension_semantics<arbitrary>], iteration_bounds = array<i64: 1, 1>, scalar_prefetch = 0 : i64, scratch_operands = 1 : i64, tpu.core_type = #tpu.core_type<tc>, window_params = [{transform_indices = @transform_0, window_bounds = array<i64: 16, 128>}, {pipeline_mode = #tpu.pipeline_mode<synchronous>, transform_indices = @transform_1, window_bounds = array<i64: 128, 128>}, {pipeline_mode = #tpu.pipeline_mode<synchronous>, transform_indices = @transform_2, window_bounds = array<i64: 1, 128>}, {pipeline_mode = #tpu.pipeline_mode<synchronous>, transform_indices = @transform_3, window_bounds = array<i64: 128, 128>}, {pipeline_mode = #tpu.pipeline_mode<synchronous>, transform_indices = @transform_4, window_bounds = array<i64: 1, 128>}, {transform_indices = @transform_5, window_bounds = array<i64: 16, 128>}]} {
    %c0_i32 = arith.constant 0 : i32
    %0 = arith.cmpi eq, %arg1, %c0_i32 : i32
    %1 = arith.extui %0 : i1 to i32
    %c0_i32_0 = arith.constant 0 : i32
    %2 = arith.cmpi ne, %1, %c0_i32_0 : i32
    scf.if %2 {
      %cst_18 = arith.constant 0.000000e+00 : f32
      %25 = vector.broadcast %cst_18 : f32 to vector<16x128xf32>
      %c0_19 = arith.constant 0 : index
      %c0_20 = arith.constant 0 : index
      %26 = vector.load %arg8[%c0_19, %c0_20] : memref<16x128xf32, #tpu.memory_space<vmem>>, vector<16x128xf32>
      tpu.vector_store %arg8[%c0_19, %c0_20], %25 {strides = array<i32>} : memref<16x128xf32, #tpu.memory_space<vmem>>, vector<16x128xf32>,
    } else {
    }
    %c0 = arith.constant 0 : index
    %c0_1 = arith.constant 0 : index
    %3 = vector.load %arg2[%c0, %c0_1] : memref<16x128xf32, #tpu.memory_space<vmem>>, vector<16x128xf32>
    %c0_2 = arith.constant 0 : index
    %c0_3 = arith.constant 0 : index
    %4 = vector.load %arg3[%c0_2, %c0_3] : memref<128x128xf32, #tpu.memory_space<vmem>>, vector<128x128xf32>
    %cst = arith.constant dense<0.000000e+00> : vector<16x128xf32>
    %5 = tpu.matmul %3, %4, %cst {dimension_numbers = #tpu.dot_dimension_numbers<[1], [0], [0], [1], [0, 0, 1, 1], [], []>} : vector<16x128xf32>, vector<128x128xf32>, vector<16x128xf32> -> vector<16x128xf32>
    %c0_4 = arith.constant 0 : index
    %c0_5 = arith.constant 0 : index
    %6 = vector.load %arg4[%c0_4, %c0_5] : memref<1x128xf32, #tpu.memory_space<vmem>>, vector<1x128xf32>
    %7 = vector.broadcast %6 : vector<1x128xf32> to vector<16x128xf32>
    %8 = arith.addf %5, %7 : vector<16x128xf32>
    %cst_6 = arith.constant 5.000000e-01 : f32
    %9 = vector.broadcast %cst_6 : f32 to vector<16x128xf32>
    %10 = arith.mulf %9, %8 : vector<16x128xf32>
    %cst_7 = arith.constant 0.707106769 : f32
    %11 = vector.broadcast %cst_7 : f32 to vector<16x128xf32>
    %12 = arith.mulf %8, %11 : vector<16x128xf32>
    %13 = math.erf %12 : vector<16x128xf32>
    %cst_8 = arith.constant 1.000000e+00 : f32
    %14 = vector.broadcast %cst_8 : f32 to vector<16x128xf32>
    %15 = arith.addf %14, %13 : vector<16x128xf32>
    %16 = arith.mulf %10, %15 : vector<16x128xf32>
    %c0_9 = arith.constant 0 : index
    %c0_10 = arith.constant 0 : index
    %17 = vector.load %arg5[%c0_9, %c0_10] : memref<128x128xf32, #tpu.memory_space<vmem>>, vector<128x128xf32>
    %c0_11 = arith.constant 0 : index
    %c0_12 = arith.constant 0 : index
    %18 = vector.load %arg8[%c0_11, %c0_12] : memref<16x128xf32, #tpu.memory_space<vmem>>, vector<16x128xf32>
    %cst_13 = arith.constant dense<0.000000e+00> : vector<16x128xf32>
    %19 = tpu.matmul %16, %17, %cst_13 {dimension_numbers = #tpu.dot_dimension_numbers<[1], [0], [0], [1], [0, 0, 1, 1], [], []>} : vector<16x128xf32>, vector<128x128xf32>, vector<16x128xf32> -> vector<16x128xf32>
    %20 = arith.addf %18, %19 : vector<16x128xf32>
    %c0_14 = arith.constant 0 : index
    %c0_15 = arith.constant 0 : index
    %21 = vector.load %arg8[%c0_14, %c0_15] : memref<16x128xf32, #tpu.memory_space<vmem>>, vector<16x128xf32>
    tpu.vector_store %arg8[%c0_14, %c0_15], %20 {strides = array<i32>} : memref<16x128xf32, #tpu.memory_space<vmem>>, vector<16x128xf32>,
    %c0_i32_16 = arith.constant 0 : i32
    %22 = arith.cmpi eq, %arg1, %c0_i32_16 : i32
    %23 = arith.extui %22 : i1 to i32
    %c0_i32_17 = arith.constant 0 : i32
    %24 = arith.cmpi ne, %23, %c0_i32_17 : i32
    scf.if %24 {
      %c0_18 = arith.constant 0 : index
      %c0_19 = arith.constant 0 : index
      %25 = vector.load %arg8[%c0_18, %c0_19] : memref<16x128xf32, #tpu.memory_space<vmem>>, vector<16x128xf32>
      %c0_20 = arith.constant 0 : index
      %c0_21 = arith.constant 0 : index
      %26 = vector.load %arg6[%c0_20, %c0_21] : memref<1x128xf32, #tpu.memory_space<vmem>>, vector<1x128xf32>
      %27 = vector.broadcast %26 : vector<1x128xf32> to vector<16x128xf32>
      %28 = arith.addf %25, %27 : vector<16x128xf32>
      %c0_22 = arith.constant 0 : index
      %c0_23 = arith.constant 0 : index
      %29 = vector.load %arg7[%c0_22, %c0_23] : memref<16x128xf32, #tpu.memory_space<vmem>>, vector<16x128xf32>
      tpu.vector_store %arg7[%c0_22, %c0_23], %28 {strides = array<i32>} : memref<16x128xf32, #tpu.memory_space<vmem>>, vector<16x128xf32>,
    } else {
    }
    return
  }
  func.func @transform_0(%arg0: i32, %arg1: i32) -> (i32, i32) {
    %c0_i32 = arith.constant 0 : i32
    %c0_i32_0 = arith.constant 0 : i32
    return %arg0, %c0_i32 : i32, i32
  }
  func.func @transform_1(%arg0: i32, %arg1: i32) -> (i32, i32) {
    %c0_i32 = arith.constant 0 : i32
    %c0_i32_0 = arith.constant 0 : i32
    return %c0_i32, %arg1 : i32, i32
  }
  func.func @transform_2(%arg0: i32, %arg1: i32) -> (i32, i32) {
    %c0_i32 = arith.constant 0 : i32
    %c0_i32_0 = arith.constant 0 : i32
    return %c0_i32, %arg1 : i32, i32
  }
  func.func @transform_3(%arg0: i32, %arg1: i32) -> (i32, i32) {
    %c0_i32 = arith.constant 0 : i32
    %c0_i32_0 = arith.constant 0 : i32
    return %arg1, %c0_i32 : i32, i32
  }
  func.func @transform_4(%arg0: i32, %arg1: i32) -> (i32, i32) {
    %c0_i32 = arith.constant 0 : i32
    %c0_i32_0 = arith.constant 0 : i32
    %c0_i32_1 = arith.constant 0 : i32
    return %c0_i32, %c0_i32_0 : i32, i32
  }
  func.func @transform_5(%arg0: i32, %arg1: i32) -> (i32, i32) {
    %c0_i32 = arith.constant 0 : i32
    %c0_i32_0 = arith.constant 0 : i32
    return %arg0, %c0_i32 : i32, i32
  }
}

</mosaic_0001>

<bundles_post_ra>
// kernel: feed_forward_pallas.1
= control target key start
LH: loop header
LB: loop body
LE: loop exit
PB: predicated region body
PF: predicated region fallthrough
CT: control target
= control target key end

     0   :  { %10 = vsyncpa [#allocation4], 0  ;;  %s587_s0 = inlined_call_operand.vmem [shape: f32[16,128], index: 0, kind: input, shape index: {}]   ;;  %s588_s1 = inlined_call_operand.hbm [shape: f32[128,128], index: 1, kind: input, shape index: {}]   ;;  %s589_s2 = inlined_call_operand.vmem [shape: f32[1,128], index: 2, kind: input, shape index: {}]   ;;  %s590_s3 = inlined_call_operand.hbm [shape: f32[128,128], index: 3, kind: input, shape index: {}]   ;;  %s591_s4 = inlined_call_operand.vmem [shape: f32[1,128], index: 4, kind: input, shape index: {}]   ;;  %s592_s5 = inlined_call_operand.vmem [shape: f32[16,128], index: 5, kind: output, shape index: {}]  }
   0x1   :  { %11 = vsyncpa [#allocation6], 0  ;;  %s511_s18 = smov [#allocation3]   ;;  %s463_s22 = scalar_lea.hbm %s588_s1, 2048 }
   0x2   :  { %s19_s19 = sshll.u32 %s511_s18, 4  ;;  %p464_p0 = scmp.ne.s32.totalorder %s588_s1, %s463_s22  ;;  %s20_s19 = int_to_ptr.vmem [resolvable:$true] %s19_s19 }
   0x3   :  { %p467_p1 = scmp.lt.u32.totalorder %s463_s22, %s588_s1 }
   0x5   :  { %p469_p2 = pnand %p467_p1, %p464_p0 }
   0x7   :  { %472 = shalt.err (!%p469_p2)
}
   0x8   :  { %s473_s27 = scalar_lea.vmem %s20_s19, 2048  ;;  %p478_p4 = scmp.lt.s32.totalorder %s20_s19, %s20_s19 }
   0x9   :  { %p474_p3 = scmp.ne.s32.totalorder %s20_s19, %s473_s27  ;;  %p479_p5 = scmp.lt.s32.totalorder %s473_s27, %s473_s27 }
   0xb   :  { %p480_p6 = por %p479_p5, %p478_p4 }
   0xd   :  { %p481_p7 = pnand %p480_p6, %p474_p3 }
   0xf   :  { %484 = shalt.err (!%p481_p7)
}
  0x10   :  { %s512_s28 = smov 128   ;;  %s513_s29 = smov 8  }
  0x11   :  { %25 = dma.hbm_to_vmem [thread:$0]  %s588_s1, 2048, %s20_s19, [#allocation4], %s512_s28, %s512_s28, %s513_s29  }
  0x12   :  { %s514_s7 = smov [#allocation5]   ;;  %s485_s11 = scalar_lea.hbm %s590_s3, 2048 }
  0x13   :  { %s33_s8 = sshll.u32 %s514_s7, 4  ;;  %p486_p8 = scmp.ne.s32.totalorder %s590_s3, %s485_s11  ;;  %s34_s8 = int_to_ptr.vmem [resolvable:$true] %s33_s8 }
  0x14   :  { %p489_p9 = scmp.lt.u32.totalorder %s485_s11, %s590_s3 }
  0x16   :  { %p491_p10 = pnand %p489_p9, %p486_p8 }
  0x18   :  { %494 = shalt.err (!%p491_p10)
}
  0x19   :  { %s495_s16 = scalar_lea.vmem %s34_s8, 2048  ;;  %p500_p12 = scmp.lt.s32.totalorder %s34_s8, %s34_s8 }
  0x1a   :  { %p496_p11 = scmp.ne.s32.totalorder %s34_s8, %s495_s16  ;;  %p501_p13 = scmp.lt.s32.totalorder %s495_s16, %s495_s16 }
  0x1c   :  { %p502_p0 = por %p501_p13, %p500_p12 }
  0x1e   :  { %p503_p1 = pnand %p502_p0, %p496_p11 }
  0x20   :  { %506 = shalt.err (!%p503_p1)
}
  0x21   :  { %39 = dma.hbm_to_vmem [thread:$0]  %s590_s3, 2048, %s34_s8, [#allocation6], %s512_s28, %s512_s28, %s513_s29  }
  0x22   :  { %507 = dma.done.wait [#allocation4], 2048  }
  0x23   :  { %508 = vsyncadd [#allocation4], 4294965248 }
  0x24   :  { %509 = dma.done.wait [#allocation6], 2048  }
  0x25   :  { %510 = vsyncadd [#allocation6], 4294965248  ;;  %v56_v0 = vld [vmem:[#allocation3] sm:$0xff]  ;;  %v57_v1 = vld [vmem:[#allocation3 + $0x8] sm:$0xff] }
  0x26   :  { %v58_v2 = vld [vmem:[#allocation3 + $0x10] sm:$0xff]  ;;  %v391_v3 = vpack.c.bf16 %v57_v1, %v56_v0  ;;  %v59_v4 = vld [vmem:[#allocation3 + $0x18] sm:$0xff]  ;;  %v60_v6 = vld [vmem:[#allocation3 + $0x20] sm:$0xff] }
  0x27   :  { %v395_v5 = vpack.c.bf16 %v59_v4, %v58_v2  ;;  %v61_v7 = vld [vmem:[#allocation3 + $0x28] sm:$0xff]  ;;  %v62_v9 = vld [vmem:[#allocation3 + $0x30] sm:$0xff]  ;;  %v63_v10 = vld [vmem:[#allocation3 + $0x38] sm:$0xff] }
  0x28   :  { %392 = vmatprep.subr.bf16.mxu0 %v391_v3  ;;  %v399_v8 = vpack.c.bf16 %v61_v7, %v60_v6  ;;  %v54_v11 = vld [vmem:[%s587_s0] sm:$0xff]  ;;  %v165_v13 = vld [vmem:[#allocation5 + $0x8] sm:$0xff]  ;;  %v166_v14 = vld [vmem:[#allocation5 + $0x10] sm:$0xff]  ;;  %v403_v20 = vpack.c.bf16 %v63_v10, %v62_v9 }
  0x29   :  { %394 = vmatpush3.bf16.msra.mxu0 %v391_v3  ;;  %353 = vmatprep.mubr.f32.mxu0 %v54_v11  ;;  %v164_v12 = vld [vmem:[#allocation5] sm:$0xff]  ;;  %v167_v16 = vld [vmem:[#allocation5 + $0x18] sm:$0xff]  ;;  %v169_v19 = vld [vmem:[#allocation5 + $0x28] sm:$0xff] }
  0x2a   :  { %396 = vmatprep.subr.bf16.mxu0 %v395_v5  ;;  %v423_v15 = vpack.c.bf16 %v165_v13, %v164_v12  ;;  %v427_v17 = vpack.c.bf16 %v167_v16, %v166_v14  ;;  %v168_v18 = vld [vmem:[#allocation5 + $0x20] sm:$0xff]  ;;  %v65_v22 = vld [vmem:[#allocation3 + $0x48] sm:$0xff]  ;;  %v66_v25 = vld [vmem:[#allocation3 + $0x50] sm:$0xff] }
  0x2b   :  { %v64_v21 = vld [vmem:[#allocation3 + $0x40] sm:$0xff]  ;;  %v431_v23 = vpack.c.bf16 %v169_v19, %v168_v18  ;;  %v67_v26 = vld [vmem:[#allocation3 + $0x58] sm:$0xff]  ;;  %v69_v29 = vld [vmem:[#allocation3 + $0x68] sm:$0xff] }
  0x2c   :  { %424 = vmatprep.subr.bf16.mxu1 %v423_v15  ;;  %v407_v24 = vpack.c.bf16 %v65_v22, %v64_v21  ;;  %v411_v27 = vpack.c.bf16 %v67_v26, %v66_v25  ;;  %v68_v28 = vld [vmem:[#allocation3 + $0x60] sm:$0xff]  ;;  %v70_v31 = vld [vmem:[#allocation3 + $0x70] sm:$0xff]  ;;  %v71_v32 = vld [vmem:[#allocation3 + $0x78] sm:$0xff] }
  0x2d   :  { %398 = vmatpush3.bf16.msra.mxu0 %v395_v5  ;;  %426 = vmatpush3.bf16.msra.mxu1 %v423_v15  ;;  %v415_v30 = vpack.c.bf16 %v69_v29, %v68_v28  ;;  %v419_v33 = vpack.c.bf16 %v71_v32, %v70_v31  ;;  %v55_v34 = vld [vmem:[%s587_s0 + $0x8] sm:$0xff]  ;;  %v170_v35 = vld [vmem:[#allocation5 + $0x30] sm:$0xff]  ;;  %v171_v36 = vld [vmem:[#allocation5 + $0x38] sm:$0xff] }
  0x2e   :  { %400 = vmatprep.subr.bf16.mxu0 %v399_v8  ;;  %428 = vmatprep.subr.bf16.mxu1 %v427_v17  ;;  %v435_v37 = vpack.c.bf16 %v171_v36, %v170_v35  ;;  %v172_v38 = vld [vmem:[#allocation5 + $0x40] sm:$0xff]  ;;  %v173_v39 = vld [vmem:[#allocation5 + $0x48] sm:$0xff]  ;;  %v174_v41 = vld [vmem:[#allocation5 + $0x50] sm:$0xff] }
  0x2f   :  { %v439_v40 = vpack.c.bf16 %v173_v39, %v172_v38  ;;  %v175_v42 = vld [vmem:[#allocation5 + $0x58] sm:$0xff]  ;;  %v176_v44 = vld [vmem:[#allocation5 + $0x60] sm:$0xff]  ;;  %v177_v45 = vld [vmem:[#allocation5 + $0x68] sm:$0xff] }
  0x30   :  { %v443_v43 = vpack.c.bf16 %v175_v42, %v174_v41  ;;  %v447_v46 = vpack.c.bf16 %v177_v45, %v176_v44  ;;  %v178_v47 = vld [vmem:[#allocation5 + $0x70] sm:$0xff]  ;;  %v179_v48 = vld [vmem:[#allocation5 + $0x78] sm:$0xff]  ;;  %v283_v50 = vld [vmem:[%s589_s2] ss:$0 sm:$0xff] }
  0x31   :  { %402 = vmatpush3.bf16.msra.mxu0 %v399_v8  ;;  %430 = vmatpush3.bf16.msra.mxu1 %v427_v17  ;;  %v451_v49 = vpack.c.bf16 %v179_v48, %v178_v47  ;;  %v284_v1 = vld [vmem:[%s591_s4] ss:$0 sm:$0xff] }
  0x32   :  { %404 = vmatprep.subr.bf16.mxu0 %v403_v20  ;;  %432 = vmatprep.subr.bf16.mxu1 %v431_v23 }
  0x35   :  { %406 = vmatpush3.bf16.msra.mxu0 %v403_v20  ;;  %434 = vmatpush3.bf16.msra.mxu1 %v431_v23 }
  0x36   :  { %408 = vmatprep.subr.bf16.mxu0 %v407_v24  ;;  %436 = vmatprep.subr.bf16.mxu1 %v435_v37 }
  0x39   :  { %410 = vmatpush3.bf16.msra.mxu0 %v407_v24  ;;  %438 = vmatpush3.bf16.msra.mxu1 %v435_v37 }
  0x3a   :  { %412 = vmatprep.subr.bf16.mxu0 %v411_v27  ;;  %440 = vmatprep.subr.bf16.mxu1 %v439_v40 }
  0x3d   :  { %414 = vmatpush3.bf16.msra.mxu0 %v411_v27  ;;  %442 = vmatpush3.bf16.msra.mxu1 %v439_v40 }
  0x3e   :  { %416 = vmatprep.subr.bf16.mxu0 %v415_v30  ;;  %444 = vmatprep.subr.bf16.mxu1 %v443_v43 }
  0x41   :  { %418 = vmatpush3.bf16.msra.mxu0 %v415_v30  ;;  %446 = vmatpush3.bf16.msra.mxu1 %v443_v43 }
  0x42   :  { %420 = vmatprep.subr.bf16.mxu0 %v419_v33  ;;  %448 = vmatprep.subr.bf16.mxu1 %v447_v46 }
  0x45   :  { %422 = vmatpush3.bf16.msra.mxu0 %v419_v33  ;;  %450 = vmatpush3.bf16.msra.mxu1 %v447_v46 }
  0x46   :  { %452 = vmatprep.subr.bf16.mxu1 %v451_v49 }
  0x48   :  { %354 = vmatmul.mubr.f32.vlgmr.msra.gmra.mrb[0].mxu0 %v55_v34 }
  0x49   :  { %454 = vmatpush3.bf16.msra.mxu1 %v451_v49 }
 0x11b   :  { %v355_v51 = vpop.f32.mrb[0].mxu0 }
 0x11c   :  { %v151_v52 = vadd.f32 %v355_v51, %v283_v50  ;;  %v145_v53 = vpop.f32.mrb[1].mxu0 }
 0x11d   :  { %v146_v54 = vadd.f32 %v283_v50, %v145_v53 }
 0x11e   :  { %v157_v55 = vmul.f32 0.70710677, %v151_v52  ;;  %v155_v62 = vmul.f32 0.5, %v151_v52 }
 0x11f   :  { %v156_v56 = vmul.f32 0.70710677, %v146_v54  ;;  %v154_v60 = vmul.f32 0.5, %v146_v54 }
 0x120   :  { %459 = verf.f32 %v157_v55 }
 0x121   :  { %461 = verf.f32 %v156_v56 }
 0x12a   :  { %v460_v57 = vpop.eup %459 }
 0x12b   :  { %v462_v58 = vpop.eup %461  ;;  %v161_v59 = vadd.f32 1.0, %v460_v57 }
 0x12c   :  { %v160_v61 = vadd.f32 1.0, %v462_v58 }
 0x12d   :  { %v163_v0 = vmul.f32 %v161_v59, %v155_v62 }
 0x12e   :  { %v162_v63 = vmul.f32 %v160_v61, %v154_v60 }
 0x130   :  { %388 = vmatprep.mubr.f32.mxu1 %v162_v63 }
 0x131   :  { %389 = vmatmul.mubr.f32.vlgmr.msra.gmra.mrb[0].mxu1 %v163_v0 }
 0x204   :  { %v390_v2 = vpop.f32.mrb[0].mxu1 }
 0x205   :  { %v274_v3 = vadd.f32 %v390_v2, %v284_v1  ;;  %v248_v4 = vpop.f32.mrb[1].mxu1 }
 0x206   :  { %v273_v5 = vadd.f32 %v284_v1, %v248_v4 }
 0x207   :  { %276 = vst [vmem:[%s592_s5 + $0x8] sm:$0xff] %v274_v3 }
 0x208   :  { %275 = vst [vmem:[%s592_s5] sm:$0xff] %v273_v5 }
 0x209   :  { %281 = vsyncpa [#allocation4], 1 }
 0x20a   :  { %282 = vsyncpa [#allocation6], 1 }

</bundles_post_ra>
